<compile_context>
chip_gen: v6e
topology: v6e:2x2x1
jax: 0.10.0
libtpu: 0.0.40
codegen_flags: <defaults>
</compile_context>

<pallas_src>
import functools
import math

import jax
import jax.numpy as jnp
from jax.experimental import pallas as pl
from jax.experimental.pallas import tpu as pltpu

LANE = 128


def _round_up(n, m):
    return ((n + m - 1) // m) * m


def _cdiv(a, b):
    return (a + b - 1) // b


# ----------------------------------------------------------------------------
# Identity forward (MyModel_gan.forward) as a tiled Pallas copy
# ----------------------------------------------------------------------------
def _copy_kernel(x_ref, o_ref):
    o_ref[...] = x_ref[...]


def pallas_identity(x):
    """MyModel_gan.forward: return x (row-tiled Pallas copy kernel)."""
    orig_shape = x.shape
    x2 = x if x.ndim == 2 else x.reshape(-1, orig_shape[-1])
    M, N = x2.shape
    blk_m = M if M <= 512 else 512
    grid = (_cdiv(M, blk_m),)
    out = pl.pallas_call(
        _copy_kernel,
        out_shape=jax.ShapeDtypeStruct((M, N), x2.dtype),
        grid=grid,
        in_specs=[pl.BlockSpec((blk_m, N), lambda i: (i, 0))],
        out_specs=pl.BlockSpec((blk_m, N), lambda i: (i, 0)),
        compiler_params=pltpu.CompilerParams(
            dimension_semantics=("parallel",)),
    )(x2)
    return out.reshape(orig_shape)


# ----------------------------------------------------------------------------
# Fused 3-layer MLP kernel (used for G and D)
# ----------------------------------------------------------------------------
def _apply_act(h, name, *, in_kernel):
    if name == "relu":
        return jnp.maximum(h, 0.0)
    if name == "leaky_relu_0.2":
        return jnp.where(h > 0.0, h, 0.2 * h)
    if name == "tanh":
        return jnp.tanh(h)
    if name == "sigmoid":
        if in_kernel:
            # exp on EUP + approx reciprocal on EUP: keeps the epilogue off VALU.
            return pl.reciprocal(1.0 + jnp.exp(-h), approx=True)
        return jax.nn.sigmoid(h)
    if name == "none":
        return h
    raise ValueError(name)


def _fused_mlp3_kernel(x_ref, w1_ref, b1_ref, w2_ref, b2_ref, w3_ref, b3_ref,
                       o_ref, *, hidden_act, out_act):
    # Three MXU matmuls, bias + activation fused in VMEM; intermediates never
    # touch HBM.  bf16 MXU operands, f32 accumulation, bf16 store.
    xb = x_ref[...].astype(w1_ref.dtype)          # cast in-kernel (no wrapper copy)
    h = jnp.dot(xb, w1_ref[...], preferred_element_type=jnp.float32) + b1_ref[...]
    h = _apply_act(h, hidden_act, in_kernel=True).astype(w2_ref.dtype)
    h = jnp.dot(h, w2_ref[...], preferred_element_type=jnp.float32) + b2_ref[...]
    h = _apply_act(h, hidden_act, in_kernel=True).astype(w3_ref.dtype)
    h = jnp.dot(h, w3_ref[...], preferred_element_type=jnp.float32) + b3_ref[...]
    o_ref[...] = _apply_act(h, out_act, in_kernel=True).astype(o_ref.dtype)


def _pick_blk_m(M, blk_max=1024):
    """Row tile: full-M single block for tiny batches; otherwise large tiles with
    at least 2 grid steps so v7x's two TensorCores both get work."""
    if M <= 256:
        return M, (1,)
    blk = min(blk_max, max(256, _round_up(_cdiv(M, 2), 256)))
    return blk, (_cdiv(M, blk),)


def fused_mlp3(x, layers, *, hidden_act, out_act, out_dim, blk_max=1024):
    """Run a fused 3-layer MLP.  Weights are resident (constant index_map); output
    is bf16 at (near-)native width.  Ragged M handled by Pallas store masking."""
    M, K = x.shape
    w1, b1 = layers["l1"]["w"], layers["l1"]["b"]
    w2, b2 = layers["l2"]["w"], layers["l2"]["b"]
    w3, b3 = layers["l3"]["w"], layers["l3"]["b"]
    n_out = w3.shape[1]

    blk_m, grid = _pick_blk_m(M, blk_max)

    kern = functools.partial(_fused_mlp3_kernel,
                             hidden_act=hidden_act, out_act=out_act)
    out = pl.pallas_call(
        kern,
        out_shape=jax.ShapeDtypeStruct((M, n_out), jnp.bfloat16),
        grid=grid,
        in_specs=[
            pl.BlockSpec((blk_m, K), lambda i: (i, 0)),
            pl.BlockSpec(w1.shape, lambda i: (0, 0)),
            pl.BlockSpec(b1.shape, lambda i: (0, 0)),
            pl.BlockSpec(w2.shape, lambda i: (0, 0)),
            pl.BlockSpec(b2.shape, lambda i: (0, 0)),
            pl.BlockSpec(w3.shape, lambda i: (0, 0)),
            pl.BlockSpec(b3.shape, lambda i: (0, 0)),
        ],
        out_specs=pl.BlockSpec((blk_m, n_out), lambda i: (i, 0)),
        compiler_params=pltpu.CompilerParams(
            dimension_semantics=("parallel",),
            vmem_limit_bytes=64 * 1024 * 1024),
    )(x, w1, b1, w2, b2, w3, b3)

    if n_out != out_dim:           # only D (1 -> 128 lane-padded) needs a crop
        out = out[:, :out_dim]
    return out


# ----------------------------------------------------------------------------
# Parameters (G and D from __init__)
# ----------------------------------------------------------------------------
def _dense(key, fan_in, fan_out, pad_out):
    kw, kb = jax.random.split(key)
    bound = 1.0 / math.sqrt(fan_in)
    w = jax.random.uniform(kw, (fan_in, fan_out), jnp.float32, -bound, bound)
    b = jax.random.uniform(kb, (fan_out,), jnp.float32, -bound, bound)
    n = _round_up(fan_out, LANE) if pad_out else fan_out
    if n != fan_out:
        w = jnp.pad(w, ((0, 0), (0, n - fan_out)))
        b = jnp.pad(b, ((0, n - fan_out),))
    return {"w": w.astype(jnp.bfloat16),                 # bf16 MXU operands
            "b": b.reshape(1, n).astype(jnp.float32)}    # f32 bias, add post-acc


def init_gan_params(key):
    kg1, kg2, kg3, kd1, kd2, kd3 = jax.random.split(key, 6)
    # G: Linear(64,256)+ReLU, Linear(256,256)+ReLU, Linear(256,784)+Tanh
    # TODO(synk): the spec's G uses `nn.ReLU` (missing parentheses) at position 4 —
    # that Sequential would crash if ever called; the intended ReLU is used here.
    G = {"l1": _dense(kg1, 64, 256, pad_out=False),
         "l2": _dense(kg2, 256, 256, pad_out=False),
         "l3": _dense(kg3, 256, 784, pad_out=False)}   # native 784-wide output
    # D: Linear(784,256)+LeakyReLU(0.2) x2, Linear(256,1)+Sigmoid
    D = {"l1": _dense(kd1, 784, 256, pad_out=False),
         "l2": _dense(kd2, 256, 256, pad_out=False),
         "l3": _dense(kd3, 256, 1, pad_out=True)}      # 128-lane-dense store, crop to 1
    return {"G": G, "D": D}


# ----------------------------------------------------------------------------
# Forward functions
# ----------------------------------------------------------------------------
def my_model_gan_forward(params, x):
    # MyModel_gan.forward(x) returns x unchanged; G/D are never applied there.
    del params
    return pallas_identity(x)


def generator_forward(params, z):
    return fused_mlp3(z, params["G"], hidden_act="relu", out_act="tanh",
                      out_dim=784)


def discriminator_forward(params, img):
    return fused_mlp3(img, params["D"], hidden_act="leaky_relu_0.2",
                      out_act="sigmoid", out_dim=1)


# ----------------------------------------------------------------------------
# Pure-JAX reference for the MLPs (numerical sanity check)
# ----------------------------------------------------------------------------
def _ref_mlp3(x, layers, hidden_act, out_act, out_dim):
    h = x.astype(jnp.float32)
    for name, act in (("l1", hidden_act), ("l2", hidden_act), ("l3", out_act)):
        w = layers[name]["w"].astype(jnp.float32)
        b = layers[name]["b"].astype(jnp.float32)
        h = _apply_act(h @ w + b, act, in_kernel=False)
    return h[:, :out_dim]


if __name__ == "__main__":
    key = jax.random.PRNGKey(0)
    k_params, k_x, k_z, k_img, k_zl, k_il = jax.random.split(key, 6)
    params = init_gan_params(k_params)

    # 1) Model forward: identity, exactly as the PyTorch module's forward.
    x = jax.random.normal(k_x, (2, 64), jnp.float32)
    y = jax.block_until_ready(my_model_gan_forward(params, x))
    assert y.shape == x.shape, y.shape
    assert float(jnp.max(jnp.abs(y - x))) == 0.0, "identity forward mismatch"

    # 2) Generator net (defined in __init__) as one fused Pallas kernel.
    z = jax.random.normal(k_z, (2, 64), jnp.float32)
    g = jax.block_until_ready(generator_forward(params, z))
    assert g.shape == (2, 784), g.shape
    g_ref = _ref_mlp3(z, params["G"], "relu", "tanh", 784)
    g_diff = float(jnp.max(jnp.abs(g.astype(jnp.float32) - g_ref)))
    assert g_diff < 5e-2, f"generator mismatch vs reference: {g_diff}"

    # 3) Discriminator net (defined in __init__) as one fused Pallas kernel.
    img = jax.random.normal(k_img, (2, 784), jnp.float32)
    d = jax.block_until_ready(discriminator_forward(params, img))
    assert d.shape == (2, 1), d.shape
    d_ref = _ref_mlp3(img, params["D"], "leaky_relu_0.2", "sigmoid", 1)
    d_diff = float(jnp.max(jnp.abs(d.astype(jnp.float32) - d_ref)))
    assert d_diff < 5e-2, f"discriminator mismatch vs reference: {d_diff}"

    # 4) Larger batch: exercise the multi-step (tiled, 2-TC-friendly) grid path.
    zl = jax.random.normal(k_zl, (512, 64), jnp.float32)
    gl = jax.block_until_ready(generator_forward(params, zl))
    gl_ref = _ref_mlp3(zl, params["G"], "relu", "tanh", 784)
    gl_diff = float(jnp.max(jnp.abs(gl.astype(jnp.float32) - gl_ref)))
    assert gl.shape == (512, 784) and gl_diff < 5e-2, gl_diff

    il = jax.random.normal(k_il, (512, 784), jnp.float32)
    dl = jax.block_until_ready(discriminator_forward(params, il))
    dl_ref = _ref_mlp3(il, params["D"], "leaky_relu_0.2", "sigmoid", 1)
    dl_diff = float(jnp.max(jnp.abs(dl.astype(jnp.float32) - dl_ref)))
    assert dl.shape == (512, 1) and dl_diff < 5e-2, dl_diff

    print("KERNEL_OK")
</pallas_src>

<mosaic_0001>
module attributes {stable_mosaic.version = 11 : i64} {
  func.func @_copy_kernel(%arg0: i32, %arg1: memref<2x64xf32, #tpu.memory_space<vmem>>, %arg2: memref<2x64xf32, #tpu.memory_space<vmem>>) attributes {dimension_semantics = [#tpu.dimension_semantics<parallel>], iteration_bounds = array<i64: 1>, scalar_prefetch = 0 : i64, scratch_operands = 0 : i64, tpu.core_type = #tpu.core_type<tc>, window_params = [{transform_indices = @transform_0, window_bounds = array<i64: 2, 64>}, {transform_indices = @transform_1, window_bounds = array<i64: 2, 64>}]} {
    %c0 = arith.constant 0 : index
    %c0_0 = arith.constant 0 : index
    %0 = vector.load %arg1[%c0, %c0_0] : memref<2x64xf32, #tpu.memory_space<vmem>>, vector<2x64xf32>
    %c0_1 = arith.constant 0 : index
    %c0_2 = arith.constant 0 : index
    %1 = vector.load %arg2[%c0_1, %c0_2] : memref<2x64xf32, #tpu.memory_space<vmem>>, vector<2x64xf32>
    tpu.vector_store %arg2[%c0_1, %c0_2], %0 {strides = array<i32>} : memref<2x64xf32, #tpu.memory_space<vmem>>, vector<2x64xf32>,
    return
  }
  func.func @transform_0(%arg0: i32) -> (i32, i32) {
    %c0_i32 = arith.constant 0 : i32
    %c0_i32_0 = arith.constant 0 : i32
    return %arg0, %c0_i32 : i32, i32
  }
  func.func @transform_1(%arg0: i32) -> (i32, i32) {
    %c0_i32 = arith.constant 0 : i32
    %c0_i32_0 = arith.constant 0 : i32
    return %arg0, %c0_i32 : i32, i32
  }
}

</mosaic_0001>

<bundles_post_ra>
// kernel: tpu_custom_call.1
= control target key start
LH: loop header
LB: loop body
LE: loop exit
PB: predicated region body
PF: predicated region fallthrough
CT: control target
= control target key end

     0   :  { %6 = vsyncpa [#allocation3], 0  ;;  %s103_s0 = inlined_call_operand.hbm [shape: f32[2,64], index: 0, kind: input, shape index: {}]   ;;  %s104_s1 = inlined_call_operand.hbm [shape: f32[2,64], index: 1, kind: output, shape index: {}]  }
   0x1   :  { %7 = vsyncpa [#allocation4], 0  ;;  %s85_s6 = smov [#allocation2]  }
   0x2   :  { %s14_s7 = sshll.u32 %s85_s6, 4  ;;  %s15_s7 = int_to_ptr.vmem [resolvable:$true] %s14_s7 }
   0x3   :  { %s49_s8 = scalar_lea.vmem %s15_s7, 32  ;;  %p54_p1 = scmp.lt.s32.totalorder %s15_s7, %s15_s7 }
   0x4   :  { %p50_p0 = scmp.ne.s32.totalorder %s15_s7, %s49_s8  ;;  %p55_p2 = scmp.lt.s32.totalorder %s49_s8, %s49_s8 }
   0x6   :  { %p56_p3 = por %p55_p2, %p54_p1 }
   0x8   :  { %p57_p4 = pnand %p56_p3, %p50_p0 }
   0xa   :  { %60 = shalt.err (!%p57_p4)
}
   0xb   :  { %17 = dma.hbm_to_vmem [thread:$0]  %s103_s0, 32, %s15_s7, [#allocation3]  }
   0xc   :  { %81 = dma.done.wait [#allocation3], 32  }
   0xd   :  { %82 = vsyncadd [#allocation3], 4294967264  ;;  %s86_s11 = smov [#allocation5]   ;;  %vm22_vm0 = vcmask 517120   ;;  %v21_v0 = vld [vmem:[#allocation2] sm:$0x3] }
   0xe   :  { %s30_s12 = sshll.u32 %s86_s11, 4  ;;  %23 = vst.msk [vmem:[#allocation5] sm:$0x3] %vm22_vm0, %v21_v0  ;;  %s31_s12 = int_to_ptr.vmem [resolvable:$true] %s30_s12 }
   0xf   :  { %s61_s13 = scalar_lea.vmem %s31_s12, 32  ;;  %p66_p6 = scmp.lt.s32.totalorder %s31_s12, %s31_s12 }
  0x10   :  { %p62_p5 = scmp.ne.s32.totalorder %s31_s12, %s61_s13  ;;  %p67_p7 = scmp.lt.s32.totalorder %s61_s13, %s61_s13 }
  0x12   :  { %p68_p8 = por %p67_p7, %p66_p6 }
  0x14   :  { %p69_p9 = pnand %p68_p8, %p62_p5 }
  0x16   :  { %72 = shalt.err (!%p69_p9)
}
  0x17   :  { %33 = dma.vmem_to_hbm [thread:$0]  %s31_s12, 32, %s104_s1, [#allocation4]  }
  0x18   :  { %83 = dma.done.wait [#allocation4], 32  }
  0x19   :  { %84 = vsyncadd [#allocation4], 4294967264 }
  0x1a   :  { %37 = vsyncpa [#allocation3], 1 }
  0x1b   :  { %38 = vsyncpa [#allocation4], 1 }

</bundles_post_ra>
